<compile_context>
chip_gen: v6e
topology: v6e:2x2x1
jax: 0.10.0
libtpu: 0.0.40
codegen_flags: <defaults>
</compile_context>

<pallas_src>
import functools

import jax
import jax.numpy as jnp
from jax import lax
from jax.experimental import pallas as pl
from jax.experimental.pallas import tpu as pltpu


_LANES = 128
_MAX_PACK = 16                          # cap on rows packed per lane-row
_VMEM_TILE_BUDGET = 24 * 1024 * 1024    # sizing budget for one grid step's working set
_VMEM_LIMIT_CAP = 48 * 1024 * 1024      # stay well under v7x's 64 MiB physical VMEM


def _round_up(x, m):
    return (x + m - 1) // m * m


def _brier_kernel(x_ref, hot_ref, out_ref, *, rows, tile, ngroups, ncls):
    """One tile of packed rows.

    x_ref   : (tile, ngroups*ncls) logits; `ngroups` original rows per packed row.
    hot_ref : (tile, ngroups) int32; lane index of the true class of each packed row.
    out_ref : (1, 128) f32 tile partial of  sum_rows(sum_c p_c^2 - 2*p_y).
    """
    x = x_ref[...].astype(jnp.float32)                       # (tile, W), lane-dense

    # segmented (per-original-row) max over groups of `ncls` lanes  (exact, stable)
    parts = []
    for j in range(ngroups):
        seg = x[:, j * ncls:(j + 1) * ncls]
        m = jnp.max(seg, axis=-1, keepdims=True)             # (tile, 1)
        parts.append(jnp.broadcast_to(m, seg.shape))
    m_full = parts[0] if ngroups == 1 else jnp.concatenate(parts, axis=-1)

    e = jnp.exp(x - m_full)                                  # dense EUP pass

    # segmented softmax denominator
    parts = []
    for j in range(ngroups):
        seg = e[:, j * ncls:(j + 1) * ncls]
        s = jnp.sum(seg, axis=-1, keepdims=True)
        parts.append(jnp.broadcast_to(s, seg.shape))
    denom = parts[0] if ngroups == 1 else jnp.concatenate(parts, axis=-1)

    r = pl.reciprocal(denom, approx=True)                    # EUP slot
    r = r * (2.0 - denom * r)                                # Newton step -> ~f32 accuracy
    p = e * r                                                # softmax, lane-dense

    # one-hot via lane-index compare; per element p^2 - 2*p*onehot = p*(p - 2*onehot)
    hot = hot_ref[...]                                       # (tile, ngroups) int32
    lane = lax.broadcasted_iota(jnp.int32, p.shape, 1)
    hit = lane == hot[:, 0:1]
    for j in range(1, ngroups):
        hit = hit | (lane == hot[:, j:j + 1])
    contrib = p * jnp.where(hit, p - 2.0, p)

    row_sum = jnp.sum(contrib, axis=-1, keepdims=True)       # (tile, 1)

    if rows % tile != 0:
        # Ragged last tile: mask whole packed rows *after* the lane reduction
        # (jnp.where selects, so garbage/NaN from edge-block reads is dropped).
        ridx = lax.broadcasted_iota(jnp.int32, row_sum.shape, 0) + pl.program_id(0) * tile
        row_sum = jnp.where(ridx < rows, row_sum, 0.0)

    out_ref[...] = jnp.full(out_ref.shape, jnp.sum(row_sum), dtype=jnp.float32)


def _brier_sum_jnp(logits, labels):
    """Plain-JAX Brier *sum* for a handful of leftover rows (< pack factor)."""
    p = jax.nn.softmax(logits.astype(jnp.float32), axis=1)
    oh = jax.nn.one_hot(labels, logits.shape[1], dtype=jnp.float32)
    return jnp.sum((oh - p) ** 2)


def brier_score_loss(logits, labels, *, tile_rows=None):
    """logits: (N, C), labels: (N,) int -> scalar f32 Brier score (matches the torch module)."""
    N, C = logits.shape
    labels = labels.reshape(-1).astype(jnp.int32)
    itemsize = jnp.dtype(logits.dtype).itemsize

    # pack `g` original rows per lane-row so the class axis fills the 128 lanes
    g = max(1, min(_LANES // C, _MAX_PACK)) if C < _LANES else 1
    n_main = (N // g) * g
    n_tail = N - n_main

    tail_sum = _brier_sum_jnp(logits[n_main:], labels[n_main:]) if n_tail else jnp.float32(0.0)
    if n_main == 0:
        return tail_sum / jnp.float32(N)

    rows = n_main // g
    W = g * C
    # Layout-preserving (free) reshape when N % g == 0; otherwise the leading slice
    # materializes one copy of the main block (small, documented trade-off).
    x_main = logits if n_tail == 0 else logits[:n_main]
    x_packed = x_main.reshape(rows, W)
    hot = (labels[:n_main] + C * (jnp.arange(n_main, dtype=jnp.int32) % g)).reshape(rows, g)

    # ---- tile sizing (lane-padding aware VMEM estimate) ----
    row_mult = max(8, 32 // itemsize)                 # 8 for f32, 16 for bf16
    w_pad = _round_up(W, _LANES)
    bytes_per_row = (2 * w_pad * itemsize             # double-buffered logits block
                     + 2 * _LANES * 4                 # double-buffered (lane-padded) hot block
                     + 8 * w_pad * 4)                 # in-kernel f32 temporaries (headroom)
    if row_mult * bytes_per_row > _VMEM_LIMIT_CAP:
        # TODO(synk): add a class-axis grid dimension with an online/two-pass softmax.
        raise ValueError(f"num_classes={C} too large for a single-tile class axis")

    if tile_rows is not None:
        tile = max(row_mult, (int(tile_rows) // row_mult) * row_mult)
    else:
        tile = max(row_mult, (_VMEM_TILE_BUDGET // bytes_per_row) // row_mult * row_mult)
        if rows >= 4 * row_mult:
            # keep >= 4 grid steps so v7x's two TensorCores stay load-balanced
            balanced = max(row_mult, (pl.cdiv(rows, 4) // row_mult) * row_mult)
            tile = min(tile, balanced)
    if tile >= rows:
        tile = rows                                   # single full-extent tile is always legal
    num_tiles = pl.cdiv(rows, tile)

    est = tile * bytes_per_row + (1 << 20)
    vmem_limit = int(min(_VMEM_LIMIT_CAP, max(16 * 1024 * 1024, int(1.25 * est) + (2 << 20))))

    kernel = functools.partial(_brier_kernel, rows=rows, tile=tile, ngroups=g, ncls=C)

    partials = pl.pallas_call(
        kernel,
        out_shape=jax.ShapeDtypeStruct((num_tiles, _LANES), jnp.float32),
        grid_spec=pltpu.PrefetchScalarGridSpec(
            num_scalar_prefetch=0,
            grid=(num_tiles,),
            in_specs=[
                pl.BlockSpec((tile, W), lambda i: (i, 0)),
                pl.BlockSpec((tile, g), lambda i: (i, 0)),
            ],
            out_specs=pl.BlockSpec((1, _LANES), lambda i: (i, 0)),
        ),
        compiler_params=pltpu.CompilerParams(
            dimension_semantics=("parallel",),        # independent tiles -> megacore on v7x
            vmem_limit_bytes=vmem_limit,
        ),
    )(x_packed, hot)

    # per row: sum_c(onehot - p)^2 = sum_c p^2 - 2*p_y + 1   -> add the "+1" terms here
    main_sum = jnp.sum(partials[:, 0]) + jnp.float32(n_main)
    return (main_sum + tail_sum) / jnp.float32(N)


def _ref_brier(logits, labels):
    sm = jax.nn.softmax(logits.astype(jnp.float32), axis=1)
    oh = jax.nn.one_hot(labels, logits.shape[1], dtype=jnp.float32)
    return jnp.sum((oh - sm) ** 2) / logits.shape[0]


if __name__ == "__main__":
    ks = jax.random.split(jax.random.PRNGKey(0), 8)

    # 1) small packed path (C=32 -> 4 rows per lane-row), N % 4 == 0
    N, C = 16, 32
    x = jax.random.normal(ks[0], (N, C), dtype=jnp.float32)
    y = jax.random.randint(ks[1], (N,), 0, C, dtype=jnp.int32)
    out = jax.block_until_ready(brier_score_loss(x, y))
    ref = _ref_brier(x, y)
    assert jnp.allclose(out, ref, rtol=1e-5, atol=1e-5), (out, ref)

    # 2) batch not divisible by the pack factor: leftover row via the tiny jnp fix-up
    N2, C2 = 21, 32
    x2 = jax.random.normal(ks[2], (N2, C2), dtype=jnp.float32)
    y2 = jax.random.randint(ks[3], (N2,), 0, C2, dtype=jnp.int32)
    out2 = jax.block_until_ready(brier_score_loss(x2, y2))
    ref2 = _ref_brier(x2, y2)
    assert jnp.allclose(out2, ref2, rtol=1e-5, atol=1e-5), (out2, ref2)

    # 3) multi-tile grid with a ragged last tile (exercises the in-kernel row mask)
    N3, C3 = 88, 32
    x3 = jax.random.normal(ks[4], (N3, C3), dtype=jnp.float32)
    y3 = jax.random.randint(ks[5], (N3,), 0, C3, dtype=jnp.int32)
    out3 = jax.block_until_ready(brier_score_loss(x3, y3, tile_rows=8))
    ref3 = _ref_brier(x3, y3)
    assert jnp.allclose(out3, ref3, rtol=1e-5, atol=1e-5), (out3, ref3)

    # 4) wide-class fallback (C > 128 -> no packing) with bf16 inputs (no wrapper upcast)
    N4, C4 = 16, 160
    x4 = jax.random.normal(ks[6], (N4, C4), dtype=jnp.float32).astype(jnp.bfloat16)
    y4 = jax.random.randint(ks[7], (N4,), 0, C4, dtype=jnp.int32)
    out4 = jax.block_until_ready(brier_score_loss(x4, y4))
    ref4 = _ref_brier(x4, y4)
    assert jnp.allclose(out4, ref4, rtol=1e-5, atol=1e-5), (out4, ref4)

    print("KERNEL_OK")
</pallas_src>

<mosaic_0001>
module attributes {stable_mosaic.version = 11 : i64} {
  func.func @_brier_kernel(%arg0: i32, %arg1: memref<4x128xf32, #tpu.memory_space<vmem>>, %arg2: memref<4x4xi32, #tpu.memory_space<vmem>>, %arg3: memref<1x128xf32, #tpu.memory_space<vmem>>) attributes {dimension_semantics = [#tpu.dimension_semantics<parallel>], iteration_bounds = array<i64: 1>, scalar_prefetch = 0 : i64, scratch_operands = 0 : i64, tpu.core_type = #tpu.core_type<tc>, window_params = [{transform_indices = @transform_0, window_bounds = array<i64: 4, 128>}, {transform_indices = @transform_1, window_bounds = array<i64: 4, 4>}, {transform_indices = @transform_2, window_bounds = array<i64: 1, 128>}]} {
    %c0 = arith.constant 0 : index
    %c0_0 = arith.constant 0 : index
    %0 = vector.load %arg1[%c0, %c0_0] : memref<4x128xf32, #tpu.memory_space<vmem>>, vector<4x128xf32>
    %1 = vector.extract_strided_slice %0 {offsets = [0, 0], sizes = [4, 32], strides = [1, 1]} : vector<4x128xf32> to vector<4x32xf32>
    %cst = arith.constant dense<0xFF800000> : vector<4xf32>
    %2 = vector.multi_reduction <maximumf>, %1, %cst [1] : vector<4x32xf32> to vector<4xf32>
    %3 = vector.shape_cast %2 : vector<4xf32> to vector<4x1xf32>
    %4 = vector.shape_cast %3 : vector<4x1xf32> to vector<4x1xf32>
    %5 = vector.broadcast %4 : vector<4x1xf32> to vector<4x32xf32>
    %6 = vector.extract_strided_slice %0 {offsets = [0, 32], sizes = [4, 32], strides = [1, 1]} : vector<4x128xf32> to vector<4x32xf32>
    %cst_1 = arith.constant dense<0xFF800000> : vector<4xf32>
    %7 = vector.multi_reduction <maximumf>, %6, %cst_1 [1] : vector<4x32xf32> to vector<4xf32>
    %8 = vector.shape_cast %7 : vector<4xf32> to vector<4x1xf32>
    %9 = vector.shape_cast %8 : vector<4x1xf32> to vector<4x1xf32>
    %10 = vector.broadcast %9 : vector<4x1xf32> to vector<4x32xf32>
    %11 = vector.extract_strided_slice %0 {offsets = [0, 64], sizes = [4, 32], strides = [1, 1]} : vector<4x128xf32> to vector<4x32xf32>
    %cst_2 = arith.constant dense<0xFF800000> : vector<4xf32>
    %12 = vector.multi_reduction <maximumf>, %11, %cst_2 [1] : vector<4x32xf32> to vector<4xf32>
    %13 = vector.shape_cast %12 : vector<4xf32> to vector<4x1xf32>
    %14 = vector.shape_cast %13 : vector<4x1xf32> to vector<4x1xf32>
    %15 = vector.broadcast %14 : vector<4x1xf32> to vector<4x32xf32>
    %16 = vector.extract_strided_slice %0 {offsets = [0, 96], sizes = [4, 32], strides = [1, 1]} : vector<4x128xf32> to vector<4x32xf32>
    %cst_3 = arith.constant dense<0xFF800000> : vector<4xf32>
    %17 = vector.multi_reduction <maximumf>, %16, %cst_3 [1] : vector<4x32xf32> to vector<4xf32>
    %18 = vector.shape_cast %17 : vector<4xf32> to vector<4x1xf32>
    %19 = vector.shape_cast %18 : vector<4x1xf32> to vector<4x1xf32>
    %20 = vector.broadcast %19 : vector<4x1xf32> to vector<4x32xf32>
    %21 = tpu.concatenate %5, %10, %15, %20 in 1 : vector<4x32xf32>, vector<4x32xf32>, vector<4x32xf32>, vector<4x32xf32> -> vector<4x128xf32>
    %22 = arith.subf %0, %21 : vector<4x128xf32>
    %23 = math.exp %22 : vector<4x128xf32>
    %24 = vector.extract_strided_slice %23 {offsets = [0, 0], sizes = [4, 32], strides = [1, 1]} : vector<4x128xf32> to vector<4x32xf32>
    %cst_4 = arith.constant dense<0.000000e+00> : vector<4xf32>
    %25 = vector.multi_reduction <add>, %24, %cst_4 [1] : vector<4x32xf32> to vector<4xf32>
    %26 = vector.shape_cast %25 : vector<4xf32> to vector<4x1xf32>
    %27 = vector.shape_cast %26 : vector<4x1xf32> to vector<4x1xf32>
    %28 = vector.broadcast %27 : vector<4x1xf32> to vector<4x32xf32>
    %29 = vector.extract_strided_slice %23 {offsets = [0, 32], sizes = [4, 32], strides = [1, 1]} : vector<4x128xf32> to vector<4x32xf32>
    %cst_5 = arith.constant dense<0.000000e+00> : vector<4xf32>
    %30 = vector.multi_reduction <add>, %29, %cst_5 [1] : vector<4x32xf32> to vector<4xf32>
    %31 = vector.shape_cast %30 : vector<4xf32> to vector<4x1xf32>
    %32 = vector.shape_cast %31 : vector<4x1xf32> to vector<4x1xf32>
    %33 = vector.broadcast %32 : vector<4x1xf32> to vector<4x32xf32>
    %34 = vector.extract_strided_slice %23 {offsets = [0, 64], sizes = [4, 32], strides = [1, 1]} : vector<4x128xf32> to vector<4x32xf32>
    %cst_6 = arith.constant dense<0.000000e+00> : vector<4xf32>
    %35 = vector.multi_reduction <add>, %34, %cst_6 [1] : vector<4x32xf32> to vector<4xf32>
    %36 = vector.shape_cast %35 : vector<4xf32> to vector<4x1xf32>
    %37 = vector.shape_cast %36 : vector<4x1xf32> to vector<4x1xf32>
    %38 = vector.broadcast %37 : vector<4x1xf32> to vector<4x32xf32>
    %39 = vector.extract_strided_slice %23 {offsets = [0, 96], sizes = [4, 32], strides = [1, 1]} : vector<4x128xf32> to vector<4x32xf32>
    %cst_7 = arith.constant dense<0.000000e+00> : vector<4xf32>
    %40 = vector.multi_reduction <add>, %39, %cst_7 [1] : vector<4x32xf32> to vector<4xf32>
    %41 = vector.shape_cast %40 : vector<4xf32> to vector<4x1xf32>
    %42 = vector.shape_cast %41 : vector<4x1xf32> to vector<4x1xf32>
    %43 = vector.broadcast %42 : vector<4x1xf32> to vector<4x32xf32>
    %44 = tpu.concatenate %28, %33, %38, %43 in 1 : vector<4x32xf32>, vector<4x32xf32>, vector<4x32xf32>, vector<4x32xf32> -> vector<4x128xf32>
    %45 = tpu.reciprocal %44 {approx = true} : vector<4x128xf32> -> vector<4x128xf32>
    %46 = arith.mulf %44, %45 : vector<4x128xf32>
    %cst_8 = arith.constant 2.000000e+00 : f32
    %47 = vector.broadcast %cst_8 : f32 to vector<4x128xf32>
    %48 = arith.subf %47, %46 : vector<4x128xf32>
    %49 = arith.mulf %45, %48 : vector<4x128xf32>
    %50 = arith.mulf %23, %49 : vector<4x128xf32>
    %c0_9 = arith.constant 0 : index
    %c0_10 = arith.constant 0 : index
    %51 = vector.load %arg2[%c0_9, %c0_10] : memref<4x4xi32, #tpu.memory_space<vmem>>, vector<4x4xi32>
    %52 = tpu.iota {dimensions = array<i32: 1>} : vector<4x128xi32>
    %53 = vector.extract_strided_slice %51 {offsets = [0, 0], sizes = [4, 1], strides = [1, 1]} : vector<4x4xi32> to vector<4x1xi32>
    %54 = vector.broadcast %53 : vector<4x1xi32> to vector<4x128xi32>
    %55 = arith.cmpi eq, %52, %54 : vector<4x128xi32>
    %56 = vector.extract_strided_slice %51 {offsets = [0, 1], sizes = [4, 1], strides = [1, 1]} : vector<4x4xi32> to vector<4x1xi32>
    %57 = vector.broadcast %56 : vector<4x1xi32> to vector<4x128xi32>
    %58 = arith.cmpi eq, %52, %57 : vector<4x128xi32>
    %59 = arith.ori %55, %58 : vector<4x128xi1>
    %60 = vector.extract_strided_slice %51 {offsets = [0, 2], sizes = [4, 1], strides = [1, 1]} : vector<4x4xi32> to vector<4x1xi32>
    %61 = vector.broadcast %60 : vector<4x1xi32> to vector<4x128xi32>
    %62 = arith.cmpi eq, %52, %61 : vector<4x128xi32>
    %63 = arith.ori %59, %62 : vector<4x128xi1>
    %64 = vector.extract_strided_slice %51 {offsets = [0, 3], sizes = [4, 1], strides = [1, 1]} : vector<4x4xi32> to vector<4x1xi32>
    %65 = vector.broadcast %64 : vector<4x1xi32> to vector<4x128xi32>
    %66 = arith.cmpi eq, %52, %65 : vector<4x128xi32>
    %67 = arith.ori %63, %66 : vector<4x128xi1>
    %cst_11 = arith.constant 2.000000e+00 : f32
    %68 = vector.broadcast %cst_11 : f32 to vector<4x128xf32>
    %69 = arith.subf %50, %68 : vector<4x128xf32>
    %70 = arith.select %67, %69, %50 : vector<4x128xi1>, vector<4x128xf32>
    %71 = arith.mulf %50, %70 : vector<4x128xf32>
    %cst_12 = arith.constant dense<0.000000e+00> : vector<4xf32>
    %72 = vector.multi_reduction <add>, %71, %cst_12 [1] : vector<4x128xf32> to vector<4xf32>
    %73 = vector.shape_cast %72 : vector<4xf32> to vector<4x1xf32>
    %74 = vector.shape_cast %73 : vector<4x1xf32> to vector<1x4x1xf32>
    %cst_13 = arith.constant dense<0.000000e+00> : vector<1xf32>
    %75 = vector.multi_reduction <add>, %74, %cst_13 [1, 2] : vector<1x4x1xf32> to vector<1xf32>
    %76 = vector.shape_cast %75 : vector<1xf32> to vector<1x1x1xf32>
    %77 = vector.extract %76[0, 0, 0] : f32 from vector<1x1x1xf32>
    %78 = vector.broadcast %77 : f32 to vector<1x128xf32>
    %c0_14 = arith.constant 0 : index
    %c0_15 = arith.constant 0 : index
    %79 = vector.load %arg3[%c0_14, %c0_15] : memref<1x128xf32, #tpu.memory_space<vmem>>, vector<1x128xf32>
    tpu.vector_store %arg3[%c0_14, %c0_15], %78 {strides = array<i32>} : memref<1x128xf32, #tpu.memory_space<vmem>>, vector<1x128xf32>,
    return
  }
  func.func @transform_0(%arg0: i32) -> (i32, i32) {
    %c0_i32 = arith.constant 0 : i32
    %c0_i32_0 = arith.constant 0 : i32
    return %arg0, %c0_i32 : i32, i32
  }
  func.func @transform_1(%arg0: i32) -> (i32, i32) {
    %c0_i32 = arith.constant 0 : i32
    %c0_i32_0 = arith.constant 0 : i32
    return %arg0, %c0_i32 : i32, i32
  }
  func.func @transform_2(%arg0: i32) -> (i32, i32) {
    %c0_i32 = arith.constant 0 : i32
    %c0_i32_0 = arith.constant 0 : i32
    return %arg0, %c0_i32 : i32, i32
  }
}

</mosaic_0001>

<bundles_post_ra>
// kernel: tpu_custom_call.1
= control target key start
LH: loop header
LB: loop body
LE: loop exit
PB: predicated region body
PF: predicated region fallthrough
CT: control target
= control target key end

     0   :  { %7 = vsyncpa [#allocation3], 0  ;;  %s283_s0 = inlined_call_operand.hbm [shape: f32[4,128], index: 0, kind: input, shape index: {}]   ;;  %s284_s1 = inlined_call_operand.hbm [shape: s32[4,4], index: 1, kind: input, shape index: {}]   ;;  %s285_s2 = inlined_call_operand.hbm [shape: f32[1,128], index: 2, kind: output, shape index: {}]  }
   0x1   :  { %8 = vsyncpa [#allocation6], 0 }
   0x2   :  { %9 = vsyncpa [#allocation4], 0  ;;  %s238_s9 = smov [#allocation2]   ;;  %s239_s11 = smov [#allocation5]  }
   0x3   :  { %s16_s10 = sshll.u32 %s238_s9, 4  ;;  %s26_s12 = sshll.u32 %s239_s11, 4  ;;  %s17_s10 = int_to_ptr.vmem [resolvable:$true] %s16_s10  ;;  %s27_s12 = int_to_ptr.vmem [resolvable:$true] %s26_s12 }
   0x4   :  { %s180_s13 = scalar_lea.vmem %s17_s10, 64  ;;  %p185_p1 = scmp.lt.s32.totalorder %s17_s10, %s17_s10 }
   0x5   :  { %p181_p0 = scmp.ne.s32.totalorder %s17_s10, %s180_s13  ;;  %p186_p2 = scmp.lt.s32.totalorder %s180_s13, %s180_s13 }
   0x7   :  { %p187_p3 = por %p186_p2, %p185_p1 }
   0x9   :  { %p188_p4 = pnand %p187_p3, %p181_p0 }
   0xb   :  { %191 = shalt.err (!%p188_p4)
}
   0xc   :  { %19 = dma.hbm_to_vmem [thread:$0]  %s283_s0, 64, %s17_s10, [#allocation3]  }
   0xd   :  { %s200_s16 = scalar_lea.vmem %s27_s12, 64  ;;  %p205_p6 = scmp.lt.s32.totalorder %s27_s12, %s27_s12 }
   0xe   :  { %p201_p5 = scmp.ne.s32.totalorder %s27_s12, %s200_s16  ;;  %p206_p7 = scmp.lt.s32.totalorder %s200_s16, %s200_s16 }
  0x10   :  { %p207_p8 = por %p206_p7, %p205_p6 }
  0x12   :  { %p208_p9 = pnand %p207_p8, %p201_p5 }
  0x14   :  { %211 = shalt.err (!%p208_p9)
}
  0x15   :  { %29 = dma.hbm_to_vmem [thread:$0]  %s284_s1, 64, %s27_s12, [#allocation6]  }
  0x16   :  { %232 = dma.done.wait [#allocation3], 64  }
  0x17   :  { %233 = vsyncadd [#allocation3], 4294967232 }
  0x18   :  { %234 = dma.done.wait [#allocation6], 64  }
  0x19   :  { %235 = vsyncadd [#allocation6], 4294967232  ;;  %vm37_vm0 = vcmask 257024   ;;  %vm45_vm1 = vcmask 781824   ;;  %v36_v0 = vld [vmem:[#allocation2] sm:$0xf]  ;;  %v93_v35 = vlaneseq }
  0x1a   :  { %vm41_vm2 = vcmask 519424   ;;  %vm49_vm3 = vcmask 1044224   ;;  %v38_v1 = vsel %vm37_vm0, %v36_v0, -inf  ;;  %v46_v2 = vsel %vm45_vm1, %v36_v0, -inf  ;;  %s242_s0 = smov 64   ;;  %s243_s1 = smov 96  }
  0x1b   :  { %39 = vmax.xlane.f32.xlu0 %v38_v1  ;;  %47 = vmax.xlane.f32.xlu1 %v46_v2  ;;  %v42_v3 = vsel %vm41_vm2, %v36_v0, -inf  ;;  %v50_v4 = vsel %vm49_vm3, %v36_v0, -inf  ;;  %v240_v5 = vmov 0   ;;  %vm53_vm4 = vcmask 261120   ;;  %s244_s19 = smov 32   ;;  %s247_s20 = smov [#allocation7]  }
  0x1c   :  { %163 = vset.pattern.permute.xlu1 %v240_v5  ;;  %vm55_vm5 = vcmask 523264   ;;  %vm57_vm6 = vcmask 785408   ;;  %v241_v15 = vmov 1   ;;  %v92_v17 = vld [vmem:[#allocation5] sm:$0xf]  ;;  %v245_v18 = vmov 2  }
  0x1d   :  { %164 = vset.pattern.permute.xlu0 %v241_v15  ;;  %v246_v20 = vmov 3   ;;  %v94_v38 = vand.u32 127, %v93_v35  ;;  %vm117_vm14 = vcmask 1043456   ;;  %vm121_vm15 = vcmask 3072   ;;  %s140_s21 = sshll.u32 %s247_s20, 4  ;;  %s141_s21 = int_to_ptr.vmem [resolvable:$true] %s140_s21 }
  0x1e   :  { %s212_s23 = scalar_lea.vmem %s141_s21, 16  ;;  %s216_s24 = scalar_lea.vmem %s141_s21, 32 }
  0x1f   :  { %43 = vmax.xlane.f32.xlu0 %v42_v3  ;;  %51 = vmax.xlane.f32.xlu1 %v50_v4  ;;  %p213_p10 = scmp.ne.s32.totalorder %s141_s21, %s212_s23  ;;  %p217_p11 = scmp.lt.s32.totalorder %s141_s21, %s141_s21 }
  0x20   :  { %p218_p12 = scmp.lt.s32.totalorder %s216_s24, %s212_s23 }
  0x22   :  { %p219_p13 = por %p218_p12, %p217_p11 }
  0x24   :  { %p220_p0 = pnand %p219_p13, %p213_p10 }
  0xa4   :  { %v40_v6 = vpop.xlane.xlu0 %39  ;;  %v48_v7 = vpop.xlane.xlu1 %47 }
  0xa8   :  { %v44_v8 = vpop.xlane.xlu0 %43  ;;  %v52_v9 = vpop.xlane.xlu1 %51 }
  0xa9   :  { %v54_v10 = vsel %vm53_vm4, %v40_v6, %v44_v8 }
  0xaa   :  { %v56_v11 = vsel %vm55_vm5, %v54_v10, %v48_v7 }
  0xab   :  { %v58_v12 = vsel %vm57_vm6, %v56_v11, %v52_v9 }
  0xac   :  { %v59_v13 = vsub.f32 %v36_v0, %v58_v12 }
  0xae   :  { %v60_v14 = vmul.f32 1.442695, %v59_v13 }
  0xb0   :  { %168 = vpow2.f32 %v60_v14 }
  0xbd   :  { %v169_v16 = vpop.eup %168 }
  0xbe   :  { %72 = vrot.lane.b32.xlu1 %v169_v16, %s242_s0  ;;  %66 = vrot.lane.b32.xlu0 %v169_v16, %s243_s1  ;;  %v62_v19 = vsel %vm37_vm0, %v169_v16, 0.0 }
  0xc2   :  { %78 = vrot.lane.b32.xlu1 %v169_v16, %s244_s19 }
  0xc6   :  { %96 = vperm.xlu1 %163, %v92_v17  }
  0xca   :  { %165 = vset.pattern.permute.xlu1 %v245_v18 }
  0xea   :  { %63 = vadd.xlane.f32.xlu1 %v62_v19 }
  0xfb   :  { %105 = vperm.xlu1 %165, %v92_v17  }
  0xff   :  { %166 = vset.pattern.permute.xlu1 %v246_v20 }
 0x100   :  { %110 = vperm.xlu1 %166, %v92_v17  }
 0x130   :  { %v73_v21 = vpop.permute.xlu1 %72  ;;  %v67_v22 = vpop.permute.xlu0 %66 }
 0x131   :  { %v69_v23 = vsel %vm37_vm0, %v67_v22, 0.0  ;;  %v75_v24 = vsel %vm37_vm0, %v73_v21, 0.0 }
 0x132   :  { %70 = vadd.xlane.f32.xlu0 %v69_v23 }
 0x134   :  { %v79_v25 = vpop.permute.xlu1 %78 }
 0x135   :  { %v81_v26 = vsel %vm37_vm0, %v79_v25, 0.0 }
 0x136   :  { %76 = vadd.xlane.f32.xlu0 %v75_v24 }
 0x13a   :  { %82 = vadd.xlane.f32.xlu0 %v81_v26 }
 0x141   :  { %v97_v27 = vpop.permute.xlu1 %96 }
 0x142   :  { %vm98_vm8 = vcmp.eq.s32.totalorder %v94_v38, %v97_v27 }
 0x150   :  { %100 = vperm.xlu0 %164, %v92_v17  }
 0x154   :  { %167 = vset.pattern.permute.xlu0 %v246_v20 }
 0x173   :  { %v64_v30 = vpop.xlane.xlu1 %63 }
 0x177   :  { %v106_v36 = vpop.permute.xlu1 %105 }
 0x178   :  { %vm107_vm9 = vcmp.eq.s32.totalorder %v94_v38, %v106_v36 }
 0x17b   :  { %v111_v42 = vpop.permute.xlu1 %110 }
 0x17c   :  { %vm112_vm12 = vcmp.eq.s32.totalorder %v94_v38, %v111_v42 }
 0x1bb   :  { %v71_v28 = vpop.xlane.xlu0 %70 }
 0x1bc   :  { %v84_v31 = vsel %vm53_vm4, %v64_v30, %v71_v28 }
 0x1bf   :  { %v77_v29 = vpop.xlane.xlu0 %76 }
 0x1c0   :  { %v85_v32 = vsel %vm55_vm5, %v84_v31, %v77_v29 }
 0x1c3   :  { %v83_v33 = vpop.xlane.xlu0 %82 }
 0x1c4   :  { %v86_v34 = vsel %vm57_vm6, %v85_v32, %v83_v33 }
 0x1c5   :  { %170 = vrcp.f32 %v86_v34 }
 0x1cb   :  { %v101_v37 = vpop.permute.xlu0 %100 }
 0x1cc   :  { %vm102_vm7 = vcmp.eq.s32.totalorder %v94_v38, %v101_v37 }
 0x1cd   :  { %vm103_vm10 = vmor %vm98_vm8, %vm102_vm7 }
 0x1ce   :  { %vm108_vm11 = vmor %vm103_vm10, %vm107_vm9 }
 0x1cf   :  { %vm113_vm13 = vmor %vm108_vm11, %vm112_vm12 }
 0x1d2   :  { %v171_v39 = vpop.eup %170 }
 0x1d3   :  { %v88_v40 = vmul.f32 %v171_v39, %v86_v34 }
 0x1d5   :  { %v89_v41 = vsub.f32 2.0, %v88_v40 }
 0x1d7   :  { %v90_v43 = vmul.f32 %v171_v39, %v89_v41 }
 0x1d9   :  { %v91_v44 = vmul.f32 %v169_v16, %v90_v43 }
 0x1db   :  { %v150_v45 = vadd.f32 -2.0, %v91_v44 }
 0x1dd   :  { %v115_v46 = vsel %vm113_vm13, %v150_v45, %v91_v44 }
 0x1de   :  { %v116_v47 = vmul.f32 %v115_v46, %v91_v44 }
 0x1e0   :  { %v118_v48 = vsel %vm117_vm14, %v116_v47, 0.0 }
 0x1e1   :  { %119 = vadd.xlane.f32.xlu1 %v118_v48 }
 0x26a   :  { %v120_v49 = vpop.xlane.xlu1 %119 }
 0x26b   :  { %v122_v50 = vsel %vm121_vm15, %v120_v49, 0.0 }
 0x26c   :  { %123 = vadd.xlane.f32.xlu0 %v122_v50 }
 0x2f5   :  { %v124_v51 = vpop.xlane.xlu0 %123 }
 0x2f6   :  { %v125_v52 = vrot.slane %v124_v51, 4 }
 0x2f8   :  { %v126_v53 = vadd.f32 %v125_v52, %v124_v51 }
 0x2fa   :  { %v127_v54 = vrot.slane %v126_v53, 2 }
 0x2fc   :  { %v128_v55 = vadd.f32 %v127_v54, %v126_v53 }
 0x2fe   :  { %v129_v56 = vrot.slane %v128_v55, 1 }
 0x300   :  { %v130_v57 = vadd.f32 %v129_v56, %v128_v55 }
 0x302   :  { %151 = vpush %v130_v57 }
 0x333   :  { %s152_s22 = spop %151 }
 0x334   :  { %v132_v58 = vstv %s152_s22 }
 0x335   :  { %133 = vst [vmem:[#allocation7] sm:$0x1] %v132_v58 }
 0x336   :  { %223 = shalt.err (!%p220_p0)
}
 0x337   :  { %143 = dma.vmem_to_hbm [thread:$0]  %s141_s21, 16, %s285_s2, [#allocation4]  }
 0x338   :  { %236 = dma.done.wait [#allocation4], 16  }
 0x339   :  { %237 = vsyncadd [#allocation4], 4294967280 }
 0x33a   :  { %147 = vsyncpa [#allocation3], 1 }
 0x33b   :  { %148 = vsyncpa [#allocation6], 1 }
 0x33c   :  { %149 = vsyncpa [#allocation4], 1 }

</bundles_post_ra>
